<compile_context>
chip_gen: v5e
topology: v5e:2x2
jax: 0.10.0
libtpu: 0.0.40
codegen_flags: <defaults>
</compile_context>

<pallas_src>
import jax
import jax.numpy as jnp
from jax.experimental import pallas as pl
from jax.experimental.pallas import tpu as pltpu

_TB_CAP = 1024   # max batch rows per grid step (mem-bound roofline ~85% here)
_ALIGN = 16      # sublane alignment for the batch tile (bf16 packs 16/vreg)


def _round_up(x, m):
    return (x + m - 1) // m * m


def _activation(x):
    # F.relu6(x * 10) / 6  ==  clip(x * (10/6), 0, 1)   (single VPU mul + clamp)
    return jnp.clip(x * (10.0 / 6.0), 0.0, 1.0)


def hippocampus_kernel(x_ref, w1_ref, b1_ref, w2_ref, b2_ref, o_ref):
    # Layer 1: Linear + Activation (x, w1 in bf16; accumulate in f32 on MXU).
    h = jnp.dot(x_ref[...], w1_ref[...], preferred_element_type=jnp.float32)
    h = _activation(h + b1_ref[...])            # b1_ref is [1, H], broadcasts
    # Layer 2: Linear + Activation (h re-cast to bf16 for native-rate MXU).
    y = jnp.dot(h.astype(jnp.bfloat16), w2_ref[...],
                preferred_element_type=jnp.float32)
    o_ref[...] = _activation(y + b2_ref[...])


def prep_params(w1, b1, w2, b2):
    """One-time parameter prep (do NOT call per forward):
    transpose PyTorch-layout weights to [in, out] and cast them to bfloat16
    (lossless: the Hippocampus weights are exactly 0.0 / 1.0); biases stay
    float32 and are reshaped to [1, features] rows for in-kernel broadcast."""
    w1_t = jnp.asarray(w1, jnp.float32).T.astype(jnp.bfloat16)   # [D_in, H]
    w2_t = jnp.asarray(w2, jnp.float32).T.astype(jnp.bfloat16)   # [H, D_out]
    b1_r = jnp.asarray(b1, jnp.float32).reshape(1, -1)           # [1, H]
    b2_r = jnp.asarray(b2, jnp.float32).reshape(1, -1)           # [1, D_out]
    return (w1_t, b1_r, w2_t, b2_r)


@jax.jit
def hippocampus_forward(x, params):
    """x: [B, D_in] float32; params from prep_params(). Returns [B, D_out] f32."""
    w1_t, b1_r, w2_t, b2_r = params
    D_in, H = w1_t.shape
    D_out = w2_t.shape[1]
    B = x.shape[0]
    if B == 0:
        return jnp.zeros((0, D_out), jnp.float32)

    # Batch tile: sublane-aligned, capped at _TB_CAP rows; pick the number of
    # grid steps so (a) padding is at most ~_ALIGN rows per step and (b) there
    # are >= 2 steps for moderate B (both v7x TensorCores get work).
    B_al = _round_up(B, _ALIGN)
    n_steps = pl.cdiv(B_al, _TB_CAP)
    if B_al > _ALIGN:
        n_steps = max(n_steps, 2)
    TB = _round_up(pl.cdiv(B_al, n_steps), _ALIGN)
    Bp = TB * n_steps

    x_bf = x.astype(jnp.bfloat16)
    if Bp != B:
        x_bf = jnp.pad(x_bf, ((0, Bp - B), (0, 0)))   # rows only; zero rows are inert

    flops = 2 * Bp * (D_in * H + H * D_out)
    bytes_accessed = (2 * Bp * D_in                     # x (bf16)
                      + 2 * (D_in * H + H * D_out)      # weights (bf16)
                      + 4 * (H + D_out)                 # biases (f32)
                      + 4 * Bp * D_out)                 # output (f32)

    # VMEM footprint estimate (double-buffered streams + resident constants).
    vmem_est = (2 * TB * D_in * 2 + 2 * TB * D_out * 4
                + 2 * (D_in * H + H * D_out) * 2
                + 2 * (H + D_out) * 4
                + TB * H * 4)
    vmem_limit = min(max(2 * vmem_est, 32 << 20), 64 << 20)   # 64 MiB = v7x-safe

    out_p = pl.pallas_call(
        hippocampus_kernel,
        out_shape=jax.ShapeDtypeStruct((Bp, D_out), jnp.float32),
        grid=(n_steps,),
        in_specs=[
            pl.BlockSpec((TB, D_in), lambda i: (i, 0)),     # x: tiled over batch
            pl.BlockSpec((D_in, H), lambda i: (0, 0)),      # w1: VMEM-resident
            pl.BlockSpec((1, H), lambda i: (0, 0)),         # b1: VMEM-resident
            pl.BlockSpec((H, D_out), lambda i: (0, 0)),     # w2: VMEM-resident
            pl.BlockSpec((1, D_out), lambda i: (0, 0)),     # b2: VMEM-resident
        ],
        out_specs=pl.BlockSpec((TB, D_out), lambda i: (i, 0)),
        compiler_params=pltpu.CompilerParams(
            dimension_semantics=("parallel",),              # shards over TCs on v7x
            vmem_limit_bytes=vmem_limit,
        ),
        cost_estimate=pl.CostEstimate(
            flops=flops, transcendentals=0, bytes_accessed=bytes_accessed),
    )(x_bf, w1_t, b1_r, w2_t, b2_r)

    return out_p[:B] if Bp != B else out_p


def init_params(key, d_in, hidden, d_out):
    """Mimic Hippocampus.__init__: weights ~ choice((0,1), p=(0.9,0.1)),
    biases keep default nn.Linear init (uniform(-1/sqrt(fan_in), ...))."""
    k1, k2, k3, k4 = jax.random.split(key, 4)
    w1 = (jax.random.uniform(k1, (hidden, d_in)) < 0.1).astype(jnp.float32)
    w2 = (jax.random.uniform(k2, (d_out, hidden)) < 0.1).astype(jnp.float32)
    bound1 = 1.0 / (d_in ** 0.5)
    bound2 = 1.0 / (hidden ** 0.5)
    b1 = jax.random.uniform(k3, (hidden,), minval=-bound1, maxval=bound1).astype(jnp.float32)
    b2 = jax.random.uniform(k4, (d_out,), minval=-bound2, maxval=bound2).astype(jnp.float32)
    return w1, b1, w2, b2


def reference_forward(x, w1, b1, w2, b2):
    act = lambda z: jnp.clip(z * 10.0, 0.0, 6.0) / 6.0   # literal relu6(x*10)/6
    h = act(x @ w1.T + b1)
    return act(h @ w2.T + b2)


if __name__ == "__main__":
    key = jax.random.PRNGKey(0)
    k_x, k_p = jax.random.split(key)

    B, D_in, H, D_out = 8, 32, 64, 32
    x = jax.random.normal(k_x, (B, D_in), dtype=jnp.float32)
    w1, b1, w2, b2 = init_params(k_p, D_in, H, D_out)

    # One-time param prep (transpose + bf16 cast); reused across forward calls.
    params = prep_params(w1, b1, w2, b2)

    out = hippocampus_forward(x, params)
    out = jax.block_until_ready(out)

    ref = reference_forward(x, w1, b1, w2, b2)
    assert out.shape == (B, D_out)
    # Loosened tolerance: activations flow through bf16 inputs (weights are
    # exact 0/1 in bf16; x / hidden carry ~0.4% relative bf16 rounding).
    assert jnp.allclose(out, ref, atol=3e-2, rtol=3e-2)

    print("KERNEL_OK")
</pallas_src>

<mosaic_0001>
module attributes {stable_mosaic.version = 11 : i64} {
  func.func @hippocampus_kernel(%arg0: i32, %arg1: memref<16x32xbf16, #tpu.memory_space<vmem>>, %arg2: memref<32x64xbf16, #tpu.memory_space<vmem>>, %arg3: memref<1x64xf32, #tpu.memory_space<vmem>>, %arg4: memref<64x32xbf16, #tpu.memory_space<vmem>>, %arg5: memref<1x32xf32, #tpu.memory_space<vmem>>, %arg6: memref<16x32xf32, #tpu.memory_space<vmem>>) attributes {dimension_semantics = [#tpu.dimension_semantics<parallel>], iteration_bounds = array<i64: 1>, scalar_prefetch = 0 : i64, scratch_operands = 0 : i64, tpu.core_type = #tpu.core_type<tc>, window_params = [{transform_indices = @transform_0, window_bounds = array<i64: 16, 32>}, {pipeline_mode = #tpu.pipeline_mode<synchronous>, transform_indices = @transform_1, window_bounds = array<i64: 32, 64>}, {pipeline_mode = #tpu.pipeline_mode<synchronous>, transform_indices = @transform_2, window_bounds = array<i64: 1, 64>}, {pipeline_mode = #tpu.pipeline_mode<synchronous>, transform_indices = @transform_3, window_bounds = array<i64: 64, 32>}, {pipeline_mode = #tpu.pipeline_mode<synchronous>, transform_indices = @transform_4, window_bounds = array<i64: 1, 32>}, {transform_indices = @transform_5, window_bounds = array<i64: 16, 32>}]} {
    %c0 = arith.constant 0 : index
    %c0_0 = arith.constant 0 : index
    %0 = vector.load %arg1[%c0, %c0_0] : memref<16x32xbf16, #tpu.memory_space<vmem>>, vector<16x32xbf16>
    %c0_1 = arith.constant 0 : index
    %c0_2 = arith.constant 0 : index
    %1 = vector.load %arg2[%c0_1, %c0_2] : memref<32x64xbf16, #tpu.memory_space<vmem>>, vector<32x64xbf16>
    %cst = arith.constant dense<0.000000e+00> : vector<16x64xf32>
    %2 = tpu.matmul %0, %1, %cst {dimension_numbers = #tpu.dot_dimension_numbers<[1], [0], [0], [1], [0, 0, 1, 1], [], []>} : vector<16x32xbf16>, vector<32x64xbf16>, vector<16x64xf32> -> vector<16x64xf32>
    %c0_3 = arith.constant 0 : index
    %c0_4 = arith.constant 0 : index
    %3 = vector.load %arg3[%c0_3, %c0_4] : memref<1x64xf32, #tpu.memory_space<vmem>>, vector<1x64xf32>
    %4 = vector.broadcast %3 : vector<1x64xf32> to vector<16x64xf32>
    %5 = arith.addf %2, %4 : vector<16x64xf32>
    %cst_5 = arith.constant 1.66666663 : f32
    %6 = vector.broadcast %cst_5 : f32 to vector<16x64xf32>
    %7 = arith.mulf %5, %6 : vector<16x64xf32>
    %cst_6 = arith.constant 0.000000e+00 : f32
    %cst_7 = arith.constant 1.000000e+00 : f32
    %8 = vector.broadcast %cst_6 : f32 to vector<16x64xf32>
    %9 = arith.maximumf %8, %7 : vector<16x64xf32>
    %10 = vector.broadcast %cst_7 : f32 to vector<16x64xf32>
    %11 = arith.minimumf %10, %9 : vector<16x64xf32>
    %12 = arith.truncf %11 : vector<16x64xf32> to vector<16x64xbf16>
    %c0_8 = arith.constant 0 : index
    %c0_9 = arith.constant 0 : index
    %13 = vector.load %arg4[%c0_8, %c0_9] : memref<64x32xbf16, #tpu.memory_space<vmem>>, vector<64x32xbf16>
    %cst_10 = arith.constant dense<0.000000e+00> : vector<16x32xf32>
    %14 = tpu.matmul %12, %13, %cst_10 {dimension_numbers = #tpu.dot_dimension_numbers<[1], [0], [0], [1], [0, 0, 1, 1], [], []>} : vector<16x64xbf16>, vector<64x32xbf16>, vector<16x32xf32> -> vector<16x32xf32>
    %c0_11 = arith.constant 0 : index
    %c0_12 = arith.constant 0 : index
    %15 = vector.load %arg5[%c0_11, %c0_12] : memref<1x32xf32, #tpu.memory_space<vmem>>, vector<1x32xf32>
    %16 = vector.broadcast %15 : vector<1x32xf32> to vector<16x32xf32>
    %17 = arith.addf %14, %16 : vector<16x32xf32>
    %cst_13 = arith.constant 1.66666663 : f32
    %18 = vector.broadcast %cst_13 : f32 to vector<16x32xf32>
    %19 = arith.mulf %17, %18 : vector<16x32xf32>
    %cst_14 = arith.constant 0.000000e+00 : f32
    %cst_15 = arith.constant 1.000000e+00 : f32
    %20 = vector.broadcast %cst_14 : f32 to vector<16x32xf32>
    %21 = arith.maximumf %20, %19 : vector<16x32xf32>
    %22 = vector.broadcast %cst_15 : f32 to vector<16x32xf32>
    %23 = arith.minimumf %22, %21 : vector<16x32xf32>
    %c0_16 = arith.constant 0 : index
    %c0_17 = arith.constant 0 : index
    %24 = vector.load %arg6[%c0_16, %c0_17] : memref<16x32xf32, #tpu.memory_space<vmem>>, vector<16x32xf32>
    tpu.vector_store %arg6[%c0_16, %c0_17], %23 {strides = array<i32>} : memref<16x32xf32, #tpu.memory_space<vmem>>, vector<16x32xf32>,
    return
  }
  func.func @transform_0(%arg0: i32) -> (i32, i32) {
    %c0_i32 = arith.constant 0 : i32
    %c0_i32_0 = arith.constant 0 : i32
    return %arg0, %c0_i32 : i32, i32
  }
  func.func @transform_1(%arg0: i32) -> (i32, i32) {
    %c0_i32 = arith.constant 0 : i32
    %c0_i32_0 = arith.constant 0 : i32
    %c0_i32_1 = arith.constant 0 : i32
    return %c0_i32, %c0_i32_0 : i32, i32
  }
  func.func @transform_2(%arg0: i32) -> (i32, i32) {
    %c0_i32 = arith.constant 0 : i32
    %c0_i32_0 = arith.constant 0 : i32
    %c0_i32_1 = arith.constant 0 : i32
    return %c0_i32, %c0_i32_0 : i32, i32
  }
  func.func @transform_3(%arg0: i32) -> (i32, i32) {
    %c0_i32 = arith.constant 0 : i32
    %c0_i32_0 = arith.constant 0 : i32
    %c0_i32_1 = arith.constant 0 : i32
    return %c0_i32, %c0_i32_0 : i32, i32
  }
  func.func @transform_4(%arg0: i32) -> (i32, i32) {
    %c0_i32 = arith.constant 0 : i32
    %c0_i32_0 = arith.constant 0 : i32
    %c0_i32_1 = arith.constant 0 : i32
    return %c0_i32, %c0_i32_0 : i32, i32
  }
  func.func @transform_5(%arg0: i32) -> (i32, i32) {
    %c0_i32 = arith.constant 0 : i32
    %c0_i32_0 = arith.constant 0 : i32
    return %arg0, %c0_i32 : i32, i32
  }
}

</mosaic_0001>

<bundles_post_ra>
// kernel: hippocampus_forward.1
= control target key start
LH: loop header
LB: loop body
LE: loop exit
PB: predicated region body
PF: predicated region fallthrough
CT: control target
= control target key end

     0   :  { %vm48_vm0 = vcmask 261120   ;;  %vm109_vm1 = vcmask 523264   ;;  %s244_s1 = inlined_call_operand.vmem [shape: bf16[32,64], index: 1, kind: input, shape index: {}]   ;;  %s245_s2 = inlined_call_operand.vmem [shape: f32[1,64], index: 2, kind: input, shape index: {}]   ;;  %s246_s0 = inlined_call_operand.vmem [shape: bf16[16,32], index: 0, kind: input, shape index: {}]   ;;  %s247_s4 = inlined_call_operand.vmem [shape: f32[1,32], index: 4, kind: input, shape index: {}]   ;;  %s248_s3 = inlined_call_operand.vmem [shape: bf16[64,32], index: 3, kind: input, shape index: {}]   ;;  %s249_s5 = inlined_call_operand.vmem [shape: f32[16,32], index: 5, kind: output, shape index: {}]  }
   0x1   :  { %v171_v0 = vld [vmem:[%s244_s1 + $0x8] sm:$0xff]  ;;  %v170_v1 = vld [vmem:[%s244_s1] sm:$0xff]  ;;  %v175_v3 = vld [vmem:[%s248_s3 + $0x18] sm:$0xff] }
   0x2   :  { %58 = vmatpush.bf16.msra.mxu0 %v171_v0  ;;  %v169_v2 = vld [vmem:[%s246_s0] sm:$0xff]  ;;  %117 = vmatpush.bf16.msra.mxu1 %v175_v3  ;;  %v174_v4 = vld [vmem:[%s248_s3 + $0x10] sm:$0xff]  ;;  %v173_v5 = vld [vmem:[%s248_s3 + $0x8] sm:$0xff] }
   0x3   :  { %v172_v6 = vld [vmem:[%s248_s3] sm:$0xff] }
   0x4   :  { %v176_v7 = vld [vmem:[%s245_s2] ss:$0 sm:$0xff] }
   0x5   :  { %v177_v19 = vld [vmem:[%s247_s4] ss:$0 sm:$0xff] }
   0x6   :  { %59 = vmatpush.bf16.msra.mxu0 %v170_v1  ;;  %118 = vmatpush.bf16.msra.mxu1 %v174_v4 }
   0x9   :  { %151 = vmatmul.msk.bf16.vlgmr.msra.gmra.mxu0 %vm48_vm0, %v169_v2 }
   0xa   :  { %119 = vmatpush.bf16.msra.mxu1 %v173_v5 }
   0xe   :  { %120 = vmatpush.bf16.msra.mxu1 %v172_v6 }
  0x86   :  { %v61_v8 = vpop.f32.mrf.mxu0 }
  0x87   :  { %v62_v9 = vadd.f32 %v176_v7, %v61_v8 }
  0x89   :  { %v66_v10 = vmul.f32 1.6666666, %v62_v9 }
  0x8b   :  { %v68_v13 = vmax.f32 %v66_v10, 0.0 }
  0x8d   :  { %v70_v16 = vmin.f32 %v68_v13, 1.0 }
  0x8e   :  { %v63_v11 = vpop.f32.mrf.mxu0 }
  0x8f   :  { %v64_v12 = vadd.f32 %v176_v7, %v63_v11 }
  0x91   :  { %v67_v14 = vmul.f32 1.6666666, %v64_v12 }
  0x93   :  { %v69_v15 = vmax.f32 %v67_v14, 0.0 }
  0x95   :  { %v71_v17 = vmin.f32 %v69_v15, 1.0 }
  0x97   :  { %v72_v18 = vpack.c.bf16 %v71_v17, %v70_v16 }
  0x99   :  { %168 = vmatmul.msk.bf16.vlgmr.msra.gmra.mxu1 %vm109_vm1, %v72_v18 }
 0x116   :  { %v122_v20 = vpop.f32.mrf.mxu1 }
 0x117   :  { %v123_v21 = vadd.f32 %v177_v19, %v122_v20 }
 0x119   :  { %v127_v22 = vmul.f32 1.6666666, %v123_v21 }
 0x11b   :  { %v129_v23 = vmax.f32 %v127_v22, 0.0 }
 0x11d   :  { %v131_v24 = vmin.f32 %v129_v23, 1.0 }
 0x11e   :  { %v124_v25 = vpop.f32.mrf.mxu1 }
 0x11f   :  { %133 = vst.msk [vmem:[%s249_s5] sm:$0xff] %vm48_vm0, %v131_v24  ;;  %v125_v26 = vadd.f32 %v177_v19, %v124_v25 }
 0x121   :  { %v128_v27 = vmul.f32 1.6666666, %v125_v26 }
 0x123   :  { %v130_v28 = vmax.f32 %v128_v27, 0.0 }
 0x125   :  { %v132_v29 = vmin.f32 %v130_v28, 1.0 }
 0x127   :  { %134 = vst.msk [vmem:[%s249_s5 + $0x8] sm:$0xff] %vm48_vm0, %v132_v29 }

</bundles_post_ra>
